<compile_context>
chip_gen: v5e
topology: v5e:2x2
jax: 0.10.0
libtpu: 0.0.40
codegen_flags: <defaults>
</compile_context>

<pallas_src>
import jax
import jax.numpy as jnp
from jax.experimental import pallas as pl
from jax.experimental.pallas import tpu as pltpu


# Large-but-finite mask value (the usual flash-attention trick): keeps the
# online softmax NaN-free when a whole kv tile is masked, while exp() of
# (masked_score - row_max) still underflows to exactly 0 for any row that has
# at least one valid key.
_MASK_VALUE = -0.7 * float(jnp.finfo(jnp.float32).max)


def _flash_attention_kernel(km_ref, q_ref, k_ref, v_ref, o_ref,
                            m_sc, l_sc, acc_sc):
    """One (batch, head-group, q-tile) block; loops over kv tiles via the grid.

    Block shapes seen here:
      km_ref : (1, tk)      float32 {0,1} kv mask for this batch / kv tile
      q_ref  : (G, tq, d)
      k_ref  : (G, tk, d)
      v_ref  : (G, tk, d)
      o_ref  : (G, tq, d)   written only on the last kv step
      m_sc   : (G, tq, 1)   running row max           (f32 scratch)
      l_sc   : (G, tq, 1)   running row sum of exp    (f32 scratch)
      acc_sc : (G, tq, d)   running unnormalized out  (f32 scratch)
    """
    ki = pl.program_id(3)

    @pl.when(ki == 0)
    def _init():
        m_sc[...] = jnp.full(m_sc.shape, _MASK_VALUE, dtype=m_sc.dtype)
        l_sc[...] = jnp.zeros(l_sc.shape, dtype=l_sc.dtype)
        acc_sc[...] = jnp.zeros(acc_sc.shape, dtype=acc_sc.dtype)

    d = q_ref.shape[-1]
    scale = 1.0 / (d ** 0.5)

    # Fold 1/sqrt(d) into q: G*tq*d multiplies instead of G*tq*tk on the scores.
    q = q_ref[...] * scale
    # QK^T with the d-contraction expressed directly (trans-b); no k transpose
    # is materialized in VMEM. Accumulate in f32 on the MXU.
    s = jnp.einsum("gqd,gkd->gqk", q, k_ref[...],
                   preferred_element_type=jnp.float32)           # (G, tq, tk)

    # Additive kv-mask bias: 0 where valid, large-negative where masked.
    # The q-mask would only add a per-row constant, and softmax is invariant to
    # per-row shifts, so it cannot change any row that has >=1 valid key; it is
    # therefore not applied here (see full_attention docstring).
    kv_bias = jnp.where(km_ref[...] == 0.0, _MASK_VALUE, 0.0)
    s = s + kv_bias.astype(jnp.float32)[None]                    # (1,1,tk) bcast

    # Online (flash) softmax update.
    m_prev = m_sc[...]
    m_new = jnp.maximum(m_prev, jnp.max(s, axis=-1, keepdims=True))
    alpha = jnp.exp(m_prev - m_new)
    p = jnp.exp(s - m_new)                                       # (G, tq, tk)
    l_sc[...] = alpha * l_sc[...] + jnp.sum(p, axis=-1, keepdims=True)
    acc_sc[...] = alpha * acc_sc[...] + jnp.einsum(
        "gqk,gkd->gqd", p.astype(v_ref.dtype), v_ref[...],
        preferred_element_type=jnp.float32)
    m_sc[...] = m_new

    # TODO(synk): nn.Dropout(0.1) on the attention weights is identity in eval
    # mode; training-mode RNG dropout is not replicated here.

    @pl.when(ki == pl.num_programs(3) - 1)
    def _finalize():
        # Deferred normalization: one reciprocal per row + (tq, d) multiplies
        # instead of (tq, tk) divides over the score tile.
        inv_l = pl.reciprocal(l_sc[...], approx=False)
        o_ref[...] = (acc_sc[...] * inv_l).astype(o_ref.dtype)


def _pick_block(dim: int, candidates) -> int:
    for c in candidates:
        if dim % c == 0:
            return c
    return dim


def full_attention(q, k, v, q_mask=None, kv_mask=None):
    """Pallas TPU forward of FullAttention (eval mode).

    q: (B, nh, L, d); k, v: (B, nh, S, d); q_mask: (B, L); kv_mask: (B, S).

    Matches the PyTorch module for every query row that has at least one valid
    (q_mask * kv_mask) key. Rows that PyTorch fills entirely with -inf (its
    softmax then returns NaN) instead get the kv-masked softmax result here —
    finite and well-defined; those are padding rows whose values are unused.
    """
    B, nh, L, d = q.shape
    S = k.shape[2]

    if kv_mask is None:
        # Same math as PyTorch's "kv_mask is None" branch: nothing is masked.
        kv_mask = jnp.ones((B, S), dtype=jnp.float32)
    # TODO(synk): q_mask only changes rows whose PyTorch output is NaN (fully
    # masked rows); it is intentionally not applied inside the kernel.
    del q_mask

    # Lane-dense mask layout: (B, 1, S); per-step block is (1, tk).
    km = kv_mask.astype(jnp.float32).reshape(B, 1, S)

    # Tile sizes: large enough to amortize per-grid-step overhead, small enough
    # to sit comfortably inside 32 MiB scoped VMEM on v5e / v6e / v7x.
    g = _pick_block(nh, (4, 2))          # heads per grid step
    tq = _pick_block(L, (256, 128))      # query rows per step
    tk = _pick_block(S, (256, 128))      # kv rows per step (reduction axis)
    grid = (B, nh // g, L // tq, S // tk)

    return pl.pallas_call(
        _flash_attention_kernel,
        out_shape=jax.ShapeDtypeStruct((B, nh, L, d), q.dtype),
        grid_spec=pltpu.PrefetchScalarGridSpec(
            num_scalar_prefetch=0,
            grid=grid,
            in_specs=[
                # kv mask: per (batch, kv-tile) block, lane-dense last dim.
                pl.BlockSpec((None, 1, tk), lambda b, h, qi, ki: (b, 0, ki)),
                pl.BlockSpec((None, g, tq, d), lambda b, h, qi, ki: (b, h, qi, 0)),
                pl.BlockSpec((None, g, tk, d), lambda b, h, qi, ki: (b, h, ki, 0)),
                pl.BlockSpec((None, g, tk, d), lambda b, h, qi, ki: (b, h, ki, 0)),
            ],
            out_specs=pl.BlockSpec((None, g, tq, d),
                                   lambda b, h, qi, ki: (b, h, qi, 0)),
            scratch_shapes=[
                pltpu.VMEM((g, tq, 1), jnp.float32),   # running max
                pltpu.VMEM((g, tq, 1), jnp.float32),   # running sum of exp
                pltpu.VMEM((g, tq, d), jnp.float32),   # unnormalized output
            ]),
        compiler_params=pltpu.CompilerParams(
            dimension_semantics=("parallel", "parallel", "parallel", "arbitrary"),
            vmem_limit_bytes=32 * 1024 * 1024),
    )(km, q, k, v)


def full_attention_reference(q, k, v, q_mask=None, kv_mask=None):
    """Pure-JAX mirror of the PyTorch forward (eval mode)."""
    d = q.shape[-1]
    scale = 1.0 / (d ** 0.5)
    w = jnp.einsum("bhld,bhsd->bhls", q, k) * scale
    if kv_mask is not None:
        attn_mask = (q_mask[:, None, :, None] * kv_mask[:, None, None, :]) == 0
        w = jnp.where(attn_mask, -jnp.inf, w)
    w = jax.nn.softmax(w, axis=-1)
    return jnp.einsum("bhls,bhsd->bhld", w, v)


if __name__ == "__main__":
    key = jax.random.PRNGKey(0)

    # --- small shape (single kv tile) --------------------------------------
    B, nh, L, S, d = 2, 4, 8, 8, 32
    kq, kk, kv_ = jax.random.split(key, 3)
    q = jax.random.normal(kq, (B, nh, L, d), dtype=jnp.float32)
    k = jax.random.normal(kk, (B, nh, S, d), dtype=jnp.float32)
    v = jax.random.normal(kv_, (B, nh, S, d), dtype=jnp.float32)
    q_mask = jnp.ones((B, L), jnp.float32)
    kv_mask = jnp.concatenate(
        [jnp.ones((B, S - 2), jnp.float32), jnp.zeros((B, 2), jnp.float32)],
        axis=-1)

    y = jax.block_until_ready(full_attention(q, k, v, q_mask, kv_mask))
    y_ref = full_attention_reference(q, k, v, q_mask, kv_mask)
    assert y.shape == (B, nh, L, d)
    assert jnp.allclose(y, y_ref, atol=2e-5, rtol=2e-5), "masked small mismatch"

    # no-mask path
    y2 = jax.block_until_ready(full_attention(q, k, v))
    y2_ref = full_attention_reference(q, k, v)
    assert jnp.allclose(y2, y2_ref, atol=2e-5, rtol=2e-5), "unmasked small mismatch"

    # --- larger shape: exercises the online-softmax kv tiling (2 kv steps) ---
    B2, nh2, L2, S2, d2 = 1, 4, 128, 512, 32
    kq2, kk2, kv2 = jax.random.split(jax.random.PRNGKey(1), 3)
    qb = jax.random.normal(kq2, (B2, nh2, L2, d2), dtype=jnp.float32)
    kb = jax.random.normal(kk2, (B2, nh2, S2, d2), dtype=jnp.float32)
    vb = jax.random.normal(kv2, (B2, nh2, S2, d2), dtype=jnp.float32)
    qm2 = jnp.ones((B2, L2), jnp.float32)
    # mask a band of keys spanning both kv tiles; every row keeps valid keys
    idx = jnp.arange(S2)
    kvm2 = jnp.where((idx >= 100) & (idx < 300), 0.0, 1.0)
    kvm2 = jnp.broadcast_to(kvm2, (B2, S2)).astype(jnp.float32)

    yb = jax.block_until_ready(full_attention(qb, kb, vb, qm2, kvm2))
    yb_ref = full_attention_reference(qb, kb, vb, qm2, kvm2)
    assert jnp.allclose(yb, yb_ref, atol=2e-5, rtol=2e-5), "tiled kv mismatch"

    print("KERNEL_OK")
</pallas_src>

<mosaic_0001>
module attributes {stable_mosaic.version = 11 : i64} {
  func.func @_flash_attention_kernel(%arg0: i32, %arg1: i32, %arg2: i32, %arg3: i32, %arg4: memref<1x1x8xf32, #tpu.memory_space<vmem>>, %arg5: memref<1x4x8x32xf32, #tpu.memory_space<vmem>>, %arg6: memref<1x4x8x32xf32, #tpu.memory_space<vmem>>, %arg7: memref<1x4x8x32xf32, #tpu.memory_space<vmem>>, %arg8: memref<1x4x8x32xf32, #tpu.memory_space<vmem>>, %arg9: memref<4x8x1xf32, #tpu.memory_space<vmem>>, %arg10: memref<4x8x1xf32, #tpu.memory_space<vmem>>, %arg11: memref<4x8x32xf32, #tpu.memory_space<vmem>>) attributes {dimension_semantics = [#tpu.dimension_semantics<parallel>, #tpu.dimension_semantics<parallel>, #tpu.dimension_semantics<parallel>, #tpu.dimension_semantics<arbitrary>], iteration_bounds = array<i64: 2, 1, 1, 1>, scalar_prefetch = 0 : i64, scratch_operands = 3 : i64, tpu.core_type = #tpu.core_type<tc>, window_params = [{transform_indices = @transform_0, window_bounds = array<i64: 1, 1, 8>}, {transform_indices = @transform_1, window_bounds = array<i64: 1, 4, 8, 32>}, {transform_indices = @transform_2, window_bounds = array<i64: 1, 4, 8, 32>}, {transform_indices = @transform_3, window_bounds = array<i64: 1, 4, 8, 32>}, {transform_indices = @transform_4, window_bounds = array<i64: 1, 4, 8, 32>}]} {
    %c0_i32 = arith.constant 0 : i32
    %0 = arith.cmpi eq, %arg3, %c0_i32 : i32
    %1 = arith.extui %0 : i1 to i32
    %c0_i32_0 = arith.constant 0 : i32
    %2 = arith.cmpi ne, %1, %c0_i32_0 : i32
    scf.if %2 {
      %cst_42 = arith.constant -2.38197633E+38 : f32
      %47 = vector.broadcast %cst_42 : f32 to vector<4x8x1xf32>
      %c0_43 = arith.constant 0 : index
      %c0_44 = arith.constant 0 : index
      %c0_45 = arith.constant 0 : index
      %48 = vector.load %arg9[%c0_43, %c0_44, %c0_45] : memref<4x8x1xf32, #tpu.memory_space<vmem>>, vector<4x8x1xf32>
      tpu.vector_store %arg9[%c0_43, %c0_44, %c0_45], %47 {strides = array<i32>} : memref<4x8x1xf32, #tpu.memory_space<vmem>>, vector<4x8x1xf32>,
      %cst_46 = arith.constant 0.000000e+00 : f32
      %49 = vector.broadcast %cst_46 : f32 to vector<4x8x1xf32>
      %c0_47 = arith.constant 0 : index
      %c0_48 = arith.constant 0 : index
      %c0_49 = arith.constant 0 : index
      %50 = vector.load %arg10[%c0_47, %c0_48, %c0_49] : memref<4x8x1xf32, #tpu.memory_space<vmem>>, vector<4x8x1xf32>
      tpu.vector_store %arg10[%c0_47, %c0_48, %c0_49], %49 {strides = array<i32>} : memref<4x8x1xf32, #tpu.memory_space<vmem>>, vector<4x8x1xf32>,
      %cst_50 = arith.constant 0.000000e+00 : f32
      %51 = vector.broadcast %cst_50 : f32 to vector<4x8x32xf32>
      %c0_51 = arith.constant 0 : index
      %c0_52 = arith.constant 0 : index
      %c0_53 = arith.constant 0 : index
      %52 = vector.load %arg11[%c0_51, %c0_52, %c0_53] : memref<4x8x32xf32, #tpu.memory_space<vmem>>, vector<4x8x32xf32>
      tpu.vector_store %arg11[%c0_51, %c0_52, %c0_53], %51 {strides = array<i32>} : memref<4x8x32xf32, #tpu.memory_space<vmem>>, vector<4x8x32xf32>,
    } else {
    }
    %c0 = arith.constant 0 : index
    %c0_1 = arith.constant 0 : index
    %c0_2 = arith.constant 0 : index
    %c0_3 = arith.constant 0 : index
    %3 = vector.load %arg5[%c0, %c0_1, %c0_2, %c0_3] : memref<1x4x8x32xf32, #tpu.memory_space<vmem>>, vector<1x4x8x32xf32>
    %4 = vector.shape_cast %3 : vector<1x4x8x32xf32> to vector<4x8x32xf32>
    %cst = arith.constant 0.176776692 : f32
    %5 = vector.broadcast %cst : f32 to vector<4x8x32xf32>
    %6 = arith.mulf %4, %5 : vector<4x8x32xf32>
    %c0_4 = arith.constant 0 : index
    %c0_5 = arith.constant 0 : index
    %c0_6 = arith.constant 0 : index
    %c0_7 = arith.constant 0 : index
    %7 = vector.load %arg6[%c0_4, %c0_5, %c0_6, %c0_7] : memref<1x4x8x32xf32, #tpu.memory_space<vmem>>, vector<1x4x8x32xf32>
    %8 = vector.shape_cast %7 : vector<1x4x8x32xf32> to vector<4x8x32xf32>
    "tpu.trace_start"() <{level = 10 : i32, message = "gqd,gkd->gqk"}> : () -> ()
    %cst_8 = arith.constant dense<0.000000e+00> : vector<4x8x8xf32>
    %9 = tpu.matmul %6, %8, %cst_8 {dimension_numbers = #tpu.dot_dimension_numbers<[2], [2], [1], [1], [0, 0, 0, 1, 1, 1], [0], [0]>} : vector<4x8x32xf32>, vector<4x8x32xf32>, vector<4x8x8xf32> -> vector<4x8x8xf32>
    "tpu.trace_stop"() : () -> ()
    %c0_9 = arith.constant 0 : index
    %c0_10 = arith.constant 0 : index
    %c0_11 = arith.constant 0 : index
    %10 = vector.load %arg4[%c0_9, %c0_10, %c0_11] : memref<1x1x8xf32, #tpu.memory_space<vmem>>, vector<1x1x8xf32>
    %11 = vector.shape_cast %10 : vector<1x1x8xf32> to vector<1x8xf32>
    %cst_12 = arith.constant 0.000000e+00 : f32
    %12 = vector.broadcast %cst_12 : f32 to vector<1x8xf32>
    %13 = arith.cmpf oeq, %11, %12 : vector<1x8xf32>
    %cst_13 = arith.constant -2.38197633E+38 : f32
    %cst_14 = arith.constant 0.000000e+00 : f32
    %14 = vector.broadcast %cst_13 : f32 to vector<1x8xf32>
    %15 = vector.broadcast %cst_14 : f32 to vector<1x8xf32>
    %16 = arith.select %13, %14, %15 : vector<1x8xi1>, vector<1x8xf32>
    %17 = vector.shape_cast %16 : vector<1x8xf32> to vector<1x1x8xf32>
    %18 = vector.broadcast %17 : vector<1x1x8xf32> to vector<4x8x8xf32>
    %19 = arith.addf %9, %18 : vector<4x8x8xf32>
    %c0_15 = arith.constant 0 : index
    %c0_16 = arith.constant 0 : index
    %c0_17 = arith.constant 0 : index
    %20 = vector.load %arg9[%c0_15, %c0_16, %c0_17] : memref<4x8x1xf32, #tpu.memory_space<vmem>>, vector<4x8x1xf32>
    %cst_18 = arith.constant dense<0xFF800000> : vector<4x8xf32>
    %21 = vector.multi_reduction <maximumf>, %19, %cst_18 [2] : vector<4x8x8xf32> to vector<4x8xf32>
    %22 = vector.shape_cast %21 : vector<4x8xf32> to vector<4x8x1xf32>
    %23 = arith.maximumf %20, %22 : vector<4x8x1xf32>
    %24 = arith.subf %20, %23 : vector<4x8x1xf32>
    %25 = math.exp %24 : vector<4x8x1xf32>
    %26 = vector.broadcast %23 : vector<4x8x1xf32> to vector<4x8x8xf32>
    %27 = arith.subf %19, %26 : vector<4x8x8xf32>
    %28 = math.exp %27 : vector<4x8x8xf32>
    %c0_19 = arith.constant 0 : index
    %c0_20 = arith.constant 0 : index
    %c0_21 = arith.constant 0 : index
    %29 = vector.load %arg10[%c0_19, %c0_20, %c0_21] : memref<4x8x1xf32, #tpu.memory_space<vmem>>, vector<4x8x1xf32>
    %30 = arith.mulf %25, %29 : vector<4x8x1xf32>
    %cst_22 = arith.constant dense<0.000000e+00> : vector<4x8xf32>
    %31 = vector.multi_reduction <add>, %28, %cst_22 [2] : vector<4x8x8xf32> to vector<4x8xf32>
    %32 = vector.shape_cast %31 : vector<4x8xf32> to vector<4x8x1xf32>
    %33 = arith.addf %30, %32 : vector<4x8x1xf32>
    %c0_23 = arith.constant 0 : index
    %c0_24 = arith.constant 0 : index
    %c0_25 = arith.constant 0 : index
    %34 = vector.load %arg10[%c0_23, %c0_24, %c0_25] : memref<4x8x1xf32, #tpu.memory_space<vmem>>, vector<4x8x1xf32>
    tpu.vector_store %arg10[%c0_23, %c0_24, %c0_25], %33 {strides = array<i32>} : memref<4x8x1xf32, #tpu.memory_space<vmem>>, vector<4x8x1xf32>,
    %c0_26 = arith.constant 0 : index
    %c0_27 = arith.constant 0 : index
    %c0_28 = arith.constant 0 : index
    %35 = vector.load %arg11[%c0_26, %c0_27, %c0_28] : memref<4x8x32xf32, #tpu.memory_space<vmem>>, vector<4x8x32xf32>
    %36 = vector.broadcast %25 : vector<4x8x1xf32> to vector<4x8x32xf32>
    %37 = arith.mulf %36, %35 : vector<4x8x32xf32>
    %c0_29 = arith.constant 0 : index
    %c0_30 = arith.constant 0 : index
    %c0_31 = arith.constant 0 : index
    %c0_32 = arith.constant 0 : index
    %38 = vector.load %arg7[%c0_29, %c0_30, %c0_31, %c0_32] : memref<1x4x8x32xf32, #tpu.memory_space<vmem>>, vector<1x4x8x32xf32>
    %39 = vector.shape_cast %38 : vector<1x4x8x32xf32> to vector<4x8x32xf32>
    "tpu.trace_start"() <{level = 10 : i32, message = "gqk,gkd->gqd"}> : () -> ()
    %cst_33 = arith.constant dense<0.000000e+00> : vector<4x8x32xf32>
    %40 = tpu.matmul %28, %39, %cst_33 {dimension_numbers = #tpu.dot_dimension_numbers<[2], [1], [1], [2], [0, 0, 0, 1, 1, 2], [0], [0]>} : vector<4x8x8xf32>, vector<4x8x32xf32>, vector<4x8x32xf32> -> vector<4x8x32xf32>
    "tpu.trace_stop"() : () -> ()
    %41 = arith.addf %37, %40 : vector<4x8x32xf32>
    %c0_34 = arith.constant 0 : index
    %c0_35 = arith.constant 0 : index
    %c0_36 = arith.constant 0 : index
    %42 = vector.load %arg11[%c0_34, %c0_35, %c0_36] : memref<4x8x32xf32, #tpu.memory_space<vmem>>, vector<4x8x32xf32>
    tpu.vector_store %arg11[%c0_34, %c0_35, %c0_36], %41 {strides = array<i32>} : memref<4x8x32xf32, #tpu.memory_space<vmem>>, vector<4x8x32xf32>,
    %c0_37 = arith.constant 0 : index
    %c0_38 = arith.constant 0 : index
    %c0_39 = arith.constant 0 : index
    %43 = vector.load %arg9[%c0_37, %c0_38, %c0_39] : memref<4x8x1xf32, #tpu.memory_space<vmem>>, vector<4x8x1xf32>
    tpu.vector_store %arg9[%c0_37, %c0_38, %c0_39], %23 {strides = array<i32>} : memref<4x8x1xf32, #tpu.memory_space<vmem>>, vector<4x8x1xf32>,
    %c0_i32_40 = arith.constant 0 : i32
    %44 = arith.cmpi eq, %arg3, %c0_i32_40 : i32
    %45 = arith.extui %44 : i1 to i32
    %c0_i32_41 = arith.constant 0 : i32
    %46 = arith.cmpi ne, %45, %c0_i32_41 : i32
    scf.if %46 {
      %c0_42 = arith.constant 0 : index
      %c0_43 = arith.constant 0 : index
      %c0_44 = arith.constant 0 : index
      %47 = vector.load %arg10[%c0_42, %c0_43, %c0_44] : memref<4x8x1xf32, #tpu.memory_space<vmem>>, vector<4x8x1xf32>
      %48 = tpu.reciprocal %47 : vector<4x8x1xf32> -> vector<4x8x1xf32>
      %c0_45 = arith.constant 0 : index
      %c0_46 = arith.constant 0 : index
      %c0_47 = arith.constant 0 : index
      %49 = vector.load %arg11[%c0_45, %c0_46, %c0_47] : memref<4x8x32xf32, #tpu.memory_space<vmem>>, vector<4x8x32xf32>
      %50 = vector.broadcast %48 : vector<4x8x1xf32> to vector<4x8x32xf32>
      %51 = arith.mulf %49, %50 : vector<4x8x32xf32>
      %c0_48 = arith.constant 0 : index
      %c0_49 = arith.constant 0 : index
      %c0_50 = arith.constant 0 : index
      %c0_51 = arith.constant 0 : index
      %52 = vector.load %arg8[%c0_48, %c0_49, %c0_50, %c0_51] : memref<1x4x8x32xf32, #tpu.memory_space<vmem>>, vector<1x4x8x32xf32>
      %53 = vector.shape_cast %52 : vector<1x4x8x32xf32> to vector<4x8x32xf32>
      %54 = vector.shape_cast %51 : vector<4x8x32xf32> to vector<1x4x8x32xf32>
      tpu.vector_store %arg8[%c0_48, %c0_49, %c0_50, %c0_51], %54 {strides = array<i32>} : memref<1x4x8x32xf32, #tpu.memory_space<vmem>>, vector<1x4x8x32xf32>,
    } else {
    }
    return
  }
  func.func @transform_0(%arg0: i32, %arg1: i32, %arg2: i32, %arg3: i32) -> (i32, i32, i32) {
    %c0_i32 = arith.constant 0 : i32
    %c0_i32_0 = arith.constant 0 : i32
    return %arg0, %c0_i32, %arg3 : i32, i32, i32
  }
  func.func @transform_1(%arg0: i32, %arg1: i32, %arg2: i32, %arg3: i32) -> (i32, i32, i32, i32) {
    %c0_i32 = arith.constant 0 : i32
    %c0_i32_0 = arith.constant 0 : i32
    return %arg0, %arg1, %arg2, %c0_i32 : i32, i32, i32, i32
  }
  func.func @transform_2(%arg0: i32, %arg1: i32, %arg2: i32, %arg3: i32) -> (i32, i32, i32, i32) {
    %c0_i32 = arith.constant 0 : i32
    %c0_i32_0 = arith.constant 0 : i32
    return %arg0, %arg1, %arg3, %c0_i32 : i32, i32, i32, i32
  }
  func.func @transform_3(%arg0: i32, %arg1: i32, %arg2: i32, %arg3: i32) -> (i32, i32, i32, i32) {
    %c0_i32 = arith.constant 0 : i32
    %c0_i32_0 = arith.constant 0 : i32
    return %arg0, %arg1, %arg3, %c0_i32 : i32, i32, i32, i32
  }
  func.func @transform_4(%arg0: i32, %arg1: i32, %arg2: i32, %arg3: i32) -> (i32, i32, i32, i32) {
    %c0_i32 = arith.constant 0 : i32
    %c0_i32_0 = arith.constant 0 : i32
    return %arg0, %arg1, %arg2, %c0_i32 : i32, i32, i32, i32
  }
}

</mosaic_0001>

<bundles_post_ra>
// kernel: tpu_custom_call.1
= control target key start
LH: loop header
LB: loop body
LE: loop exit
PB: predicated region body
PF: predicated region fallthrough
CT: control target
= control target key end

     0   :  { %s1700_s0 = inlined_call_operand.hbm [shape: f32[2,1,8], index: 0, kind: input, shape index: {}]   ;;  %s1701_s1 = inlined_call_operand.hbm [shape: f32[2,4,8,32], index: 1, kind: input, shape index: {}]   ;;  %s1702_s2 = inlined_call_operand.hbm [shape: f32[2,4,8,32], index: 2, kind: input, shape index: {}]   ;;  %s1703_s3 = inlined_call_operand.hbm [shape: f32[2,4,8,32], index: 3, kind: input, shape index: {}]   ;;  %s1704_s4 = inlined_call_operand.hbm [shape: f32[2,4,8,32], index: 4, kind: output, shape index: {}]  }
   0x1   :  { %1714 = sst [smem:[#allocation23_spill]] %s1700_s0 }
   0x2   :  { %1715 = sst [smem:[#allocation24_spill]] %s1701_s1 }
   0x3   :  { %9 = vsyncpa [#allocation6], 0 }
   0x4   :  { %11 = vsyncpa [#allocation6 + $0x1], 0 }
   0x5   :  { %12 = vsyncpa [#allocation9], 0 }
   0x6   :  { %14 = vsyncpa [#allocation9 + $0x1], 0 }
   0x7   :  { %15 = vsyncpa [#allocation12], 0 }
   0x8   :  { %17 = vsyncpa [#allocation12 + $0x1], 0 }
   0x9   :  { %18 = vsyncpa [#allocation7], 0 }
   0xa   :  { %20 = vsyncpa [#allocation7 + $0x1], 0  ;;  %s1437_s15 = smov 0   ;;  %s1439_s16 = smov 0  }
   0xb   :  { %s1441_s17 = smov 0   ;;  %s1443_s18 = smov 0  }
   0xc   :  { %s1445_s19 = smov 0   ;;  %s1447_s20 = smov 0  }
   0xd LB: > { %1716 = sst [smem:[#allocation18_spill]] %s1391_s17  ;;  %s1468_s21 = sadd.s32 4294967295, %s1403_s20   ;;  %s1403_s20 = sphi %s1447_s20, %s26_s20   ;;  %s1399_s19 = sphi %s1445_s19, %s1735_s19   ;;  %s1395_s18 = sphi %s1443_s18, %s1734_s18   ;;  %s1391_s17 = sphi %s1441_s17, %s1733_s17   ;;  %s1387_s16 = sphi %s1439_s16, %s1737_s16   ;;  %s1383_s15 = sphi %s1437_s15, %s1736_s15  }
   0xe   : > { %1717 = sst [smem:[#allocation19_spill]] %s1399_s19  ;;  %s1044_s22 = sadd.s32 4294967294, %s1403_s20  }
   0xf   : > { %1718 = sst [smem:[#allocation20_spill]] %s1403_s20  ;;  %s52_s23 = sadd.s32 1, %s1399_s19 }
  0x10   : > { %s61_s24 = sadd.s32 1, %s1391_s17  ;;  %p54_p0 = scmp.ge.s32.totalorder %s52_s23, 2 }
  0x11   : > { %p68_p1 = scmp.ne.s32.totalorder %s1391_s17, %s1387_s16  ;;  %p69_p2 = scmp.eq.s32.totalorder %s1403_s20, 0 }
  0x12   : > { %p74_p3 = scmp.ne.s32.totalorder %s1387_s16, %s1383_s15  ;;  %s1739_s23 = smov (%p54_p0, %s52_s23), 0 }
  0x13   : > { %1719 = sst [smem:[#allocation21_spill]] %s1739_s23  ;;  %p1480_p4 = por %p69_p2, %p68_p1 }
  0x14   : > { %p75_p5 = scmp.eq.s32.totalorder %s1468_s21, 0  ;;  %s56_s26 = ssub.s32 %s1399_s19, %s1739_s23 }
  0x15   : > { %p192_p6 = scmp.eq.s32.totalorder %s1468_s21, 1  ;;  %p59_p7 = scmp.eq.s32.totalorder %s56_s26, 0 }
  0x16   : > { %p1488_p8 = por %p75_p5, %p74_p3  ;;  %p198_p10 = scmp.eq.s32.totalorder %s1044_s22, 1 }
  0x17   : > { %p1492_p9 = por %p192_p6, %p68_p1  ;;  %p1046_p12 = scmp.ge.s32.totalorder %s1403_s20, 2 }
  0x18   : > { %s1497_s29 = scalar_select %p59_p7, %s1391_s17, %s61_s24  }
  0x19   : > { %p1499_p11 = por %p198_p10, %p74_p3  ;;  %p1109_p13 = scmp.lt.s32.totalorder %s1403_s20, 2 }
  0x1a   : > { %1723 = sst [smem:[#allocation22_spill]] %s1497_s29  ;;  %s1506_s5 = sand.u32 1, %s1391_s17  }
  0x1b   : > { %s236_s6 = sand.u32 1, %s1403_s20   ;;  %s1510_s7 = sshll.u32 %s1506_s5, 5 }
  0x1c   : > { %p1514_p0 = pnand %p1109_p13, %p1480_p4  ;;  %s1519_s9 = sshll.u32 %s1399_s19, 5 }
  0x1d   : > { %s1726_s1 = sld [smem:[#allocation24_spill]]  ;;  %s240_s14 = scalar_lea.vmem [#allocation8], %s1510_s7 }
  0x1e   : > { %s251_s22 = sshll.u32 %s240_s14, 4  ;;  %s237_s24 = scalar_lea.sflag [#allocation9], %s236_s6  ;;  %s252_s22 = int_to_ptr.vmem [resolvable:$true] %s251_s22 }
  0x1f   : > { %s1706_s25 = smov 128   ;;  %s1708_s26 = smov 8  }
  0x20   : > { %p1056_p1 = scmp.ge.s32.totalorder %s1403_s20, 1  ;;  %p309_p2 = scmp.lt.s32.totalorder %s1403_s20, 3 }
  0x21   : > { %s1728_s0 = sld [smem:[#allocation23_spill]]  ;;  %s265_s17 = scalar_lea.vmem [#allocation10], %s1510_s7 }
  0x22   : > { %p1533_p3 = pnand %p1056_p1, %p309_p2  ;;  %s276_s11 = sshll.u32 %s265_s17, 4  ;;  %s277_s11 = int_to_ptr.vmem [resolvable:$true] %s276_s11 }
  0x23   : > { %s248_s12 = scalar_lea.hbm %s1726_s1, %s1519_s9  ;;  %s221_s1 = scalar_lea.vmem [#allocation5], %s1506_s5 }
  0x24   : > { %s249_s13 = sshll.u32 %s248_s12, 4  ;;  %s229_s23 = sshll.u32 %s221_s1, 4  ;;  %s250_s13 = int_to_ptr.hbm [resolvable:$true] %s249_s13  ;;  %s230_s23 = int_to_ptr.vmem [resolvable:$true] %s229_s23 }
  0x25   : > { %1098 = dma.hbm_to_vmem [thread:$0]  (!%p1514_p0), %s250_s13, 512, %s252_s22, %s237_s24, %s1706_s25, %s1706_s25, %s1708_s26  }
  0x26   : > { %s219_s13 = scalar_lea.sflag [#allocation6], %s1506_s5  ;;  %s273_s26 = scalar_lea.hbm %s1702_s2, %s1519_s9 }
  0x27   : > { %s225_s6 = scalar_lea.hbm %s1728_s0, %s1399_s19  ;;  %s274_s29 = sshll.u32 %s273_s26, 4  ;;  %s275_s29 = int_to_ptr.hbm [resolvable:$true] %s274_s29 }
  0x28   : > { %s227_s14 = sshll.u32 %s225_s6, 4  ;;  %s1729_s12 = smov 8   ;;  %s228_s14 = int_to_ptr.hbm [resolvable:$true] %s227_s14 }
  0x29   : > { %1095 = dma.hbm_to_vmem [thread:$0]  (!%p1514_p0), %s228_s14, 16, %s230_s23, %s219_s13  }
  0x2a   : > { %s1730_s6 = smov 128   ;;  %s298_s19 = scalar_lea.hbm %s1703_s3, %s1519_s9 }
  0x2b   : > { %1101 = dma.hbm_to_vmem [thread:$0]  (!%p1514_p0), %s275_s29, 512, %s277_s11, %s237_s24, %s1730_s6, %s1730_s6, %s1729_s12  }
  0x2c   : > { %s290_s20 = scalar_lea.vmem [#allocation11], %s1510_s7  ;;  %s299_s14 = sshll.u32 %s298_s19, 4  ;;  %s300_s14 = int_to_ptr.hbm [resolvable:$true] %s299_s14 }
  0x2d   : > { %s301_s23 = sshll.u32 %s290_s20, 4  ;;  %s287_s25 = scalar_lea.sflag [#allocation12], %s1506_s5  ;;  %s302_s23 = int_to_ptr.vmem [resolvable:$true] %s301_s23 }
  0x2e   : > { %1104 = dma.hbm_to_vmem [thread:$0]  (!%p1514_p0), %s300_s14, 512, %s302_s23, %s287_s25, %s1730_s6, %s1730_s6, %s1729_s12  }
  0x2f   : > { %313 = sbr.rel (%p1533_p3) target bundleno = 701 (0x2bd), region = 36  ;;  %s1569_s17 = sand.u32 (!%p1533_p3), 1, %s1387_s16  }
  0x30   : > { %s316_s0 = scalar_lea.sflag (!%p1533_p3), [#allocation6], %s1569_s17  ;;  %s318_s20 = scalar_lea.vmem (!%p1533_p3), [#allocation5], %s1569_s17 }
  0x34   : > { %1366 = dma.done.wait (%p1488_p8), %s316_s0, 16  }
  0x35   : > { %1368 = vsyncadd (%p1488_p8), %s316_s0, 4294967280  ;;  %s324_s19 = sand.u32 1, %s1468_s21   ;;  %s1579_s29 = sshll.u32 %s1569_s17, 5 }
  0x36   : > { %s325_s5 = scalar_lea.sflag [#allocation9], %s324_s19  ;;  %s328_s7 = scalar_lea.vmem [#allocation8], %s1579_s29 }
  0x37   : > { %1370 = dma.done.wait (%p1488_p8), %s325_s5, 1024  }
  0x38   : > { %1372 = vsyncadd (%p1488_p8), %s325_s5, 4294966272  ;;  %s338_s8 = scalar_lea.vmem [#allocation10], %s1579_s29  ;;  %s345_s9 = scalar_lea.sflag [#allocation12], %s1569_s17 }
  0x39   : > { %s1589_s24 = scalar_lea.vmem [#allocation11], %s1579_s29 }
  0x3a   : > { %1374 = dma.done.wait (%p1488_p8), %s345_s9, 512  }
  0x3b   : > { %1376 = vsyncadd (%p1488_p8), %s345_s9, 4294966784  ;;  %vm405_vm0 = vcmask 261120   ;;  %v1407_v0 = vmov 0.0   ;;  %v418_v1 = vld [vmem:[%s338_s8] sm:$0xff]  ;;  %v420_v2 = vld [vmem:[%s338_s8 + $0x10] sm:$0xff]  ;;  %vm396_vm1 = vcmask 7168  }
  0x3c   : > { %406 = vst.msk [vmem:[#allocation4] sm:$0xff] %vm405_vm0, %v1407_v0  ;;  %v410_v3 = vld [vmem:[%s328_s7] sm:$0xff]  ;;  %1061 = vmatpush.xpose.msk.msra.mxu0 %vm405_vm0, %v418_v1  ;;  %1065 = vmatpush.xpose.msk.msra.mxu2 %vm405_vm0, %v420_v2  ;;  %v412_v5 = vld [vmem:[%s328_s7 + $0x10] sm:$0xff]  ;;  %v419_v6 = vld [vmem:[%s338_s8 + $0x8] sm:$0xff]  ;;  %v1408_v13 = vmov -2.3819763e+38  }
  0x3d   : > { %407 = vst.msk [vmem:[#allocation4 + $0x8] sm:$0xff] %vm405_vm0, %v1407_v0  ;;  %v414_v4 = vmul.f32 0.17677669, %v410_v3  ;;  %v421_v7 = vld [vmem:[%s338_s8 + $0x18] sm:$0xff]  ;;  %v416_v8 = vmul.f32 0.17677669, %v412_v5  ;;  %1063 = vmatpush.xpose.msk.msra.mxu1 %vm405_vm0, %v419_v6 }
  0x3e   : > { %408 = vst.msk [vmem:[#allocation4 + $0x10] sm:$0xff] %vm405_vm0, %v1407_v0  ;;  %1067 = vmatpush.xpose.msk.msra.mxu3 %vm405_vm0, %v421_v7  ;;  %v411_v9 = vld [vmem:[%s328_s7 + $0x8] sm:$0xff]  ;;  %v413_v10 = vld [vmem:[%s328_s7 + $0x18] sm:$0xff]  ;;  %vm537_vm3 = vcmask 64512   ;;  %v1409_v29 = vmov 0   ;;  %v657_v46 = vld [vmem:[%s1589_s24 + $0x10] sm:$0xff] }
  0x3f   : > { %409 = vst.msk [vmem:[#allocation4 + $0x18] sm:$0xff] %vm405_vm0, %v1407_v0  ;;  %v415_v11 = vmul.f32 0.17677669, %v411_v9  ;;  %v417_v12 = vmul.f32 0.17677669, %v413_v10  ;;  %1062 = vmatmul.msk.f32.vlgmr.msra.gmra.mxu0 %vm405_vm0, %v414_v4  ;;  %1066 = vmatmul.msk.f32.vlgmr.msra.gmra.mxu2 %vm405_vm0, %v416_v8  ;;  %v658_v47 = vld [vmem:[%s1589_s24 + $0x18] sm:$0xff] }
  0x40   : > { %397 = vst.msk [vmem:[#allocation2] sm:$0xff] %vm396_vm1, %v1408_v13  ;;  %v422_v14 = vld [vmem:[%s318_s20] sm:$0x1]  ;;  %1167 = vset.pattern.permute.xlu0 %v1409_v29  ;;  %1166 = vset.pattern.permute.xlu2 %v1409_v29  ;;  %v655_v48 = vld [vmem:[%s1589_s24] sm:$0xff]  ;;  %v656_v49 = vld [vmem:[%s1589_s24 + $0x8] sm:$0xff]  ;;  %s387_s21 = scalar_lea.vmem [#allocation13], %s1579_s29 }
  0x41   : > { %1064 = vmatmul.msk.f32.vlgmr.msra.gmra.mxu1 %vm405_vm0, %v415_v11  ;;  %1068 = vmatmul.msk.f32.vlgmr.msra.gmra.mxu3 %vm405_vm0, %v417_v12  ;;  %398 = vst.msk [vmem:[#allocation2 + $0x8] sm:$0xff] %vm396_vm1, %v1408_v13  ;;  %vm423_vm2 = vcmp.eq.f32.partialorder %v422_v14, 0.0  ;;  %s1081_s27 = sshll.u32 %s1395_s18, 5  ;;  %s874_s22 = sshll.u32 %s387_s21, 4  ;;  %s875_s22 = int_to_ptr.vmem [resolvable:$true] %s874_s22 }
  0x42   : > { %399 = vst.msk [vmem:[#allocation2 + $0x10] sm:$0xff] %vm396_vm1, %v1408_v13  ;;  %v424_v15 = vsel %vm423_vm2, -2.3819763e+38, %v1407_v0  ;;  %1168 = vset.pattern.permute.xlu1 %v1409_v29  ;;  %723 = vmatpush.msrb.mxu2 %v657_v46  ;;  %s873_s13 = scalar_lea.hbm %s1704_s4, %s1081_s27  ;;  %s859_s12 = scalar_lea.sflag [#allocation7], %s1569_s17 }
  0x43   : > { %400 = vst.msk [vmem:[#allocation2 + $0x18] sm:$0xff] %vm396_vm1, %v1408_v13  ;;  %v426_v16 = vperm.slane %v424_v15, 0  ;;  %746 = vmatpush.msrb.mxu3 %v658_v47  ;;  %677 = vmatpush.msrb.mxu0 %v655_v48  ;;  %s876_s11 = sshll.u32 %s873_s13, 4  ;;  %s1333_s14 = scalar_lea.hbm %s1704_s4, 64  ;;  %s877_s11 = int_to_ptr.hbm [resolvable:$true] %s876_s11 }
  0x44   : > { %401 = vst.msk [vmem:[#allocation3] sm:$0xff] %vm396_vm1, %v1407_v0  ;;  %700 = vmatpush.msrb.mxu1 %v656_v49  ;;  %s1327_s6 = sshra.s32 %s877_s11, 4  ;;  %s1328_s6 = int_to_ptr.hbm [resolvable:$true] %s1327_s6 }
  0x45   : > { %402 = vst.msk [vmem:[#allocation3 + $0x8] sm:$0xff] %vm396_vm1, %v1407_v0  ;;  %s1329_s18 = scalar_lea.hbm %s1328_s6, 32  ;;  %p1334_p7 = scmp.lt.s32.totalorder %s1328_s6, %s1704_s4 }
  0x46   : > { %403 = vst.msk [vmem:[#allocation3 + $0x10] sm:$0xff] %vm396_vm1, %v1407_v0  ;;  %p1330_p4 = scmp.ne.s32.totalorder %s1328_s6, %s1329_s18  ;;  %p1335_p8 = scmp.lt.s32.totalorder %s1333_s14, %s1329_s18 }
  0x47   : > { %404 = vst.msk [vmem:[#allocation3 + $0x18] sm:$0xff] %vm396_vm1, %v1407_v0  ;;  %v1627_v30 = vld [vmem:[#allocation2] sm:$0xff] }
  0x48   : > { %v534_v36 = vld [vmem:[#allocation2 + $0x8] sm:$0xff]  ;;  %p1331_p5 = pnand %p1330_p4, %p1492_p9  ;;  %p1336_p10 = por %p1335_p8, %p1334_p7 }
  0x49   : > { %v535_v34 = vld [vmem:[#allocation2 + $0x10] sm:$0xff] }
  0x4a   : > { %v536_v42 = vld [vmem:[#allocation2 + $0x18] sm:$0xff]  ;;  %p1332_p6 = pneg %p1331_p5 }
  0x4c   : > { %p1337_p13 = pnand %p1336_p10, %p1332_p6 }
  0x4d   : > { %v600_v14 = vld [vmem:[#allocation3 + $0x10] sm:$0xff] }
  0xbc   : > { %v452_v17 = vpop.f32.mrf.mxu0 }
  0xbd   : > { %v1617_v18 = vadd.f32 %v452_v17, %v426_v16 }
  0xbe   : > { %v478_v19 = vpop.f32.mrf.mxu1 }
  0xbf   : > { %v538_v20 = vsel %vm537_vm3, %v1617_v18, -inf  ;;  %v1621_v21 = vadd.f32 %v478_v19, %v426_v16  ;;  %v598_v19 = vld [vmem:[#allocation3] sm:$0xff] }
  0xc0   : > { %539 = vmax.xlane.f32.xlu1 %v538_v20 }
  0xc1   : > { %v541_v26 = vsel %vm537_vm3, %v1621_v21, -inf }
  0xc2   : > { %v504_v22 = vpop.f32.mrf.mxu2 }
  0xc3   : > { %v505_v23 = vadd.f32 %v504_v22, %v426_v16 }
  0xc4   : > { %v530_v24 = vpop.f32.mrf.mxu3 }
  0xc5   : > { %v544_v25 = vsel %vm537_vm3, %v505_v23, -inf  ;;  %v531_v27 = vadd.f32 %v530_v24, %v426_v16 }
  0xc6   : > { %545 = vmax.xlane.f32.xlu0 %v544_v25 }
  0xc7   : > { %v547_v28 = vsel %vm537_vm3, %v531_v27, -inf }
  0xc8   : > { %542 = vmax.xlane.f32.xlu1 %v541_v26 }
  0xce   : > { %548 = vmax.xlane.f32.xlu0 %v547_v28  ;;  %v601_v28 = vld [vmem:[#allocation3 + $0x18] sm:$0xff] }
 0x133   : > { %v540_v31 = vpop.xlane.xlu1 %539 }
 0x134   : > { %v550_v32 = vmax.f32 %v1627_v30, %v540_v31 }
 0x136   : > { %v554_v33 = vsub.f32 %v1627_v30, %v550_v32  ;;  %759 = vst.msk [vmem:[#allocation2] sm:$0xff] %vm396_vm1, %v550_v32  ;;  %568 = vperm.xlu0 %1167, %v550_v32  }
 0x138   : > { %v558_v6 = vmul.f32 1.442695, %v554_v33 }
 0x139   : > { %v546_v35 = vpop.xlane.xlu0 %545 }
 0x13a   : > { %v552_v37 = vmax.f32 %v535_v34, %v546_v35 }
 0x13b   : > { %v543_v38 = vpop.xlane.xlu1 %542 }
 0x13c   : > { %v556_v39 = vsub.f32 %v535_v34, %v552_v37  ;;  %761 = vst.msk [vmem:[#allocation2 + $0x10] sm:$0xff] %vm396_vm1, %v552_v37  ;;  %v551_v40 = vmax.f32 %v534_v36, %v543_v38  ;;  %578 = vperm.xlu2 %1166, %v552_v37  }
 0x13e   : > { %v555_v41 = vsub.f32 %v534_v36, %v551_v40  ;;  %760 = vst.msk [vmem:[#allocation2 + $0x8] sm:$0xff] %vm396_vm1, %v551_v40  ;;  %573 = vperm.xlu1 %1168, %v551_v40   ;;  %v562_v8 = vmul.f32 1.442695, %v556_v39 }
 0x140   : > { %v560_v7 = vmul.f32 1.442695, %v555_v41 }
 0x141   : > { %v549_v43 = vpop.xlane.xlu0 %548 }
 0x142   : > { %v553_v44 = vmax.f32 %v536_v42, %v549_v43 }
 0x144   : > { %v557_v45 = vsub.f32 %v536_v42, %v553_v44  ;;  %762 = vst.msk [vmem:[#allocation2 + $0x18] sm:$0xff] %vm396_vm1, %v553_v44  ;;  %583 = vperm.xlu2 %1166, %v553_v44   ;;  %v627_v42 = vld [vmem:[#allocation4] sm:$0xff] }
 0x146   : > { %v564_v11 = vmul.f32 1.442695, %v557_v45 }
 0x196   : > { %v579_v50 = vpop.permute.xlu2 %578 }
 0x197   : > { %v588_v51 = vsub.f32 %v505_v23, %v579_v50 }
 0x199   : > { %v594_v52 = vmul.f32 1.442695, %v588_v51 }
 0x19b   : > { %1169 = vpow2.f32 %v594_v52 }
 0x19e   : > { %v584_v53 = vpop.permute.xlu2 %583 }
 0x19f   : > { %v589_v54 = vsub.f32 %v531_v27, %v584_v53  ;;  %v599_v27 = vld [vmem:[#allocation3 + $0x8] sm:$0xff]  ;;  %v629_v53 = vld [vmem:[#allocation4 + $0x10] sm:$0xff] }
 0x1a1   : > { %v1170_v55 = vpop.eup %1169  ;;  %v596_v56 = vmul.f32 1.442695, %v589_v54 }
 0x1a2   : > { %1071 = vmatmul.msk.f32.vlgmr.msrb.gmra.mxu2 %vm537_vm3, %v1170_v55  ;;  %v612_v57 = vsel %vm537_vm3, %v1170_v55, 0.0 }
 0x1a3   : > { %1171 = vpow2.f32 %v596_v56  ;;  %613 = vadd.xlane.f32.xlu0 %v612_v57 }
 0x1a8   : > { %v569_v58 = vpop.permute.xlu0 %568 }
 0x1a9   : > { %v1172_v59 = vpop.eup %1171  ;;  %v586_v60 = vsub.f32 %v1617_v18, %v569_v58 }
 0x1aa   : > { %1072 = vmatmul.msk.f32.vlgmr.msrb.gmra.mxu3 %vm537_vm3, %v1172_v59  ;;  %v615_v5 = vsel %vm537_vm3, %v1172_v59, 0.0 }
 0x1ab   : > { %v590_v61 = vmul.f32 1.442695, %v586_v60 }
 0x1ad   : > { %1173 = vpow2.f32 %v590_v61 }
 0x1b0   : > { %v574_v62 = vpop.permute.xlu1 %573 }
 0x1b1   : > { %v587_v63 = vsub.f32 %v1621_v21, %v574_v62 }
 0x1b3   : > { %v1174_v0 = vpop.eup %1173  ;;  %v592_v1 = vmul.f32 1.442695, %v587_v63 }
 0x1b4   : > { %1069 = vmatmul.msk.f32.vlgmr.msrb.gmra.mxu0 %vm537_vm3, %v1174_v0  ;;  %v606_v2 = vsel %vm537_vm3, %v1174_v0, 0.0 }
 0x1b5   : > { %1175 = vpow2.f32 %v592_v1  ;;  %607 = vadd.xlane.f32.xlu2 %v606_v2 }
 0x1b6   : > { %1177 = vpow2.f32 %v558_v6 }
 0x1b7   : > { %1179 = vpow2.f32 %v560_v7  ;;  %v628_v7 = vld [vmem:[#allocation4 + $0x8] sm:$0xff] }
 0x1b8   : > { %1181 = vpow2.f32 %v562_v8  ;;  %v630_v8 = vld [vmem:[#allocation4 + $0x18] sm:$0xff] }
 0x1b9   : > { %1183 = vpow2.f32 %v564_v11 }
 0x1bb   : > { %v1176_v3 = vpop.eup %1175 }
 0x1bc   : > { %1070 = vmatmul.msk.f32.vlgmr.msrb.gmra.mxu1 %vm537_vm3, %v1176_v3  ;;  %v609_v4 = vsel %vm537_vm3, %v1176_v3, 0.0  ;;  %v1178_v9 = vpop.eup %1177 }
 0x1bd   : > { %610 = vadd.xlane.f32.xlu1 %v609_v4  ;;  %616 = vadd.xlane.f32.xlu2 %v615_v5  ;;  %v1180_v10 = vpop.eup %1179  ;;  %v602_v21 = vmul.f32 %v1178_v9, %v598_v19 }
 0x1be   : > { %v1182_v12 = vpop.eup %1181  ;;  %v603_v32 = vmul.f32 %v1180_v10, %v599_v27 }
 0x1bf   : > { %v1184_v13 = vpop.eup %1183  ;;  %v604_v15 = vmul.f32 %v1182_v12, %v600_v14 }
 0x1c0   : > { %v605_v33 = vmul.f32 %v1184_v13, %v601_v28 }
 0x1d5   : > { %633 = vperm.xlu2 %1166, %v1178_v9  }
 0x1d6   : > { %638 = vperm.xlu1 %1168, %v1180_v10  }
 0x1dd   : > { %643 = vperm.xlu2 %1166, %v1182_v12  }
 0x1e5   : > { %648 = vperm.xlu2 %1166, %v1184_v13  }
 0x216   : > { %v614_v16 = vpop.xlane.xlu0 %613 }
 0x217   : > { %v620_v17 = vadd.f32 %v614_v16, %v604_v15 }
 0x219   : > { %625 = vst.msk [vmem:[#allocation3 + $0x10] sm:$0xff] %vm396_vm1, %v620_v17 }
 0x220   : > { %v768_v18 = vld [vmem:[#allocation3 + $0x10] sm:$0xff] }
 0x221   : > { %1185 = vrcp.f32 %v768_v18  ;;  %v809_v26 = vand.u32 2147483648, %v768_v18  ;;  %v807_v30 = vand.u32 2147483647, %v768_v18  ;;  %vm803_vm5 = vweird.f32 %v768_v18 }
 0x223   : > { %v810_v34 = vor.u32 1.1754944e-38, %v809_v26  ;;  %vm808_vm7 = vcmp.eq.f32.partialorder %v807_v30, 8.507059e+37 }
 0x225   : > { %v725_v62 = vpop.f32.mrf.mxu2 }
 0x227   : > { %v1186_v20 = vpop.eup %1185 }
 0x228   : > { %v608_v22 = vpop.xlane.xlu2 %607  ;;  %v799_v23 = vmul.f32 %v1186_v20, %v768_v18  ;;  %vm804_vm4 = vweird.f32 %v1186_v20 }
 0x229   : > { %v618_v24 = vadd.f32 %v608_v22, %v602_v21  ;;  %vm805_vm6 = vmor %vm803_vm5, %vm804_vm4 }
 0x22a   : > { %v800_v25 = vsub.f32 1.0, %v799_v23 }
 0x22b   : > { %623 = vst.msk [vmem:[#allocation3] sm:$0xff] %vm396_vm1, %v618_v24 }
 0x22c   : > { %v801_v29 = vmul.f32 %v1186_v20, %v800_v25 }
 0x22d   : > { %v748_v18 = vpop.f32.mrf.mxu3 }
 0x22e   : > { %v802_v31 = vadd.f32 %v1186_v20, %v801_v29 }
 0x230   : > { %v611_v35 = vpop.xlane.xlu1 %610  ;;  %v617_v36 = vpop.xlane.xlu2 %616  ;;  %v806_v37 = vsel %vm805_vm6, %v1186_v20, %v802_v31 }
 0x231   : > { %v619_v38 = vadd.f32 %v611_v35, %v603_v32  ;;  %v621_v39 = vadd.f32 %v617_v36, %v605_v33  ;;  %v811_v40 = vsel %vm808_vm7, %v810_v34, %v806_v37  ;;  %v679_v46 = vpop.f32.mrf.mxu0 }
 0x232   : > { %842 = vperm.xlu1 %1168, %v811_v40   ;;  %v766_v41 = vld [vmem:[#allocation3] sm:$0xff] }
 0x233   : > { %624 = vst.msk [vmem:[#allocation3 + $0x8] sm:$0xff] %vm396_vm1, %v619_v38  ;;  %1187 = vrcp.f32 %v766_v41  ;;  %v781_v52 = vand.u32 2147483648, %v766_v41  ;;  %v779_v55 = vand.u32 2147483647, %v766_v41  ;;  %vm775_vm9 = vweird.f32 %v766_v41 }
 0x234   : > { %626 = vst.msk [vmem:[#allocation3 + $0x18] sm:$0xff] %vm396_vm1, %v621_v39 }
 0x235   : > { %v782_v60 = vor.u32 1.1754944e-38, %v781_v52  ;;  %vm780_vm11 = vcmp.eq.f32.partialorder %v779_v55, 8.507059e+37 }
 0x238   : > { %v634_v43 = vpop.permute.xlu2 %633 }
 0x239   : > { %v1188_v44 = vpop.eup %1187  ;;  %v651_v45 = vmul.f32 %v634_v43, %v627_v42  ;;  %v702_v19 = vpop.f32.mrf.mxu1 }
 0x23a   : > { %v771_v47 = vmul.f32 %v1188_v44, %v766_v41  ;;  %v767_v48 = vld [vmem:[#allocation3 + $0x8] sm:$0xff]  ;;  %vm776_vm8 = vweird.f32 %v1188_v44 }
 0x23b   : > { %v751_v49 = vadd.f32 %v679_v46, %v651_v45  ;;  %1189 = vrcp.f32 %v767_v48  ;;  %v769_v50 = vld [vmem:[#allocation3 + $0x18] sm:$0xff]  ;;  %vm777_vm10 = vmor %vm775_vm9, %vm776_vm8  ;;  %v795_v5 = vand.u32 2147483648, %v767_v48  ;;  %v793_v10 = vand.u32 2147483647, %v767_v48 }
 0x23c   : > { %v772_v51 = vsub.f32 1.0, %v771_v47  ;;  %1191 = vrcp.f32 %v769_v50  ;;  %vm789_vm13 = vweird.f32 %v767_v48  ;;  %v823_v25 = vand.u32 2147483648, %v769_v50 }
 0x23d   : > { %755 = vst.msk [vmem:[#allocation4] sm:$0xff] %vm405_vm0, %v751_v49  ;;  %v796_v17 = vor.u32 1.1754944e-38, %v795_v5  ;;  %vm794_vm15 = vcmp.eq.f32.partialorder %v793_v10, 8.507059e+37  ;;  %vm817_vm2 = vweird.f32 %v769_v50  ;;  %v821_v26 = vand.u32 2147483647, %v769_v50 }
 0x23e   : > { %v773_v54 = vmul.f32 %v1188_v44, %v772_v51  ;;  %v824_v28 = vor.u32 1.1754944e-38, %v823_v25 }
 0x23f   : > { %vm822_vm4 = vcmp.eq.f32.partialorder %v821_v26, 8.507059e+37 }
 0x240   : > { %v644_v56 = vpop.permute.xlu2 %643  ;;  %v774_v57 = vadd.f32 %v1188_v44, %v773_v54 }
 0x241   : > { %v1190_v58 = vpop.eup %1189  ;;  %v653_v59 = vmul.f32 %v644_v56, %v629_v53 }
 0x242   : > { %v1192_v61 = vpop.eup %1191  ;;  %v778_v63 = vsel %vm777_vm10, %v1188_v44, %v774_v57  ;;  %v785_v0 = vmul.f32 %v1190_v58, %v767_v48  ;;  %vm790_vm12 = vweird.f32 %v1190_v58 }
 0x243   : > { %v753_v1 = vadd.f32 %v725_v62, %v653_v59  ;;  %v783_v2 = vsel %vm780_vm11, %v782_v60, %v778_v63  ;;  %v813_v3 = vmul.f32 %v1192_v61, %v769_v50  ;;  %vm791_vm14 = vmor %vm789_vm13, %vm790_vm12  ;;  %vm818_vm1 = vweird.f32 %v1192_v61 }
 0x244   : > { %832 = vperm.xlu0 %1167, %v783_v2   ;;  %v786_v4 = vsub.f32 1.0, %v785_v0  ;;  %vm819_vm3 = vmor %vm817_vm2, %vm818_vm1  ;;  %v826_v39 = vld [vmem:[#allocation4] sm:$0xff] }
 0x245   : > { %757 = vst.msk [vmem:[#allocation4 + $0x10] sm:$0xff] %vm405_vm0, %v753_v1  ;;  %v814_v6 = vsub.f32 1.0, %v813_v3 }
 0x246   : > { %v787_v9 = vmul.f32 %v1190_v58, %v786_v4 }
 0x247   : > { %v815_v14 = vmul.f32 %v1192_v61, %v814_v6 }
 0x248   : > { %v639_v11 = vpop.permute.xlu1 %638  ;;  %v649_v12 = vpop.permute.xlu2 %648  ;;  %v788_v13 = vadd.f32 %v1190_v58, %v787_v9 }
 0x249   : > { %v652_v15 = vmul.f32 %v639_v11, %v628_v7  ;;  %v654_v16 = vmul.f32 %v649_v12, %v630_v8  ;;  %v816_v24 = vadd.f32 %v1192_v61, %v815_v14 }
 0x24a   : > { %v792_v20 = vsel %vm791_vm14, %v1190_v58, %v788_v13 }
 0x24b   : > { %v752_v21 = vadd.f32 %v702_v19, %v652_v15  ;;  %v754_v22 = vadd.f32 %v748_v18, %v654_v16  ;;  %v797_v23 = vsel %vm794_vm15, %v796_v17, %v792_v20  ;;  %v820_v27 = vsel %vm819_vm3, %v1192_v61, %v816_v24 }
 0x24c   : > { %837 = vperm.xlu2 %1166, %v797_v23   ;;  %v825_v29 = vsel %vm822_vm4, %v824_v28, %v820_v27  ;;  %v828_v31 = vld [vmem:[#allocation4 + $0x10] sm:$0xff] }
 0x24d   : > { %756 = vst.msk [vmem:[#allocation4 + $0x8] sm:$0xff] %vm405_vm0, %v752_v21 }
 0x24e   : > { %758 = vst.msk [vmem:[#allocation4 + $0x18] sm:$0xff] %vm405_vm0, %v754_v22 }
 0x254   : > { %847 = vperm.xlu2 %1166, %v825_v29   ;;  %v827_v33 = vld [vmem:[#allocation4 + $0x8] sm:$0xff] }
 0x255   : > { %v829_v36 = vld [vmem:[#allocation4 + $0x18] sm:$0xff] }
 0x2a4   : > { %v843_v30 = vpop.permute.xlu1 %842 }
 0x2a5   : > { %v852_v32 = vmul.f32 %v843_v30, %v828_v31 }
 0x2a6   : > { %v838_v34 = vpop.permute.xlu2 %837 }
 0x2a7   : > { %856 = vst.msk [vmem:[%s387_s21 + $0x10] sm:$0xff] %vm405_vm0, %v852_v32  ;;  %v851_v35 = vmul.f32 %v838_v34, %v827_v33 }
 0x2a9   : > { %855 = vst.msk [vmem:[%s387_s21 + $0x8] sm:$0xff] %vm405_vm0, %v851_v35 }
 0x2ae   : > { %v848_v37 = vpop.permute.xlu2 %847 }
 0x2af   : > { %v853_v38 = vmul.f32 %v848_v37, %v829_v36 }
 0x2b1   : > { %857 = vst.msk [vmem:[%s387_s21 + $0x18] sm:$0xff] %vm405_vm0, %v853_v38 }
 0x2b6   : > { %v833_v40 = vpop.permute.xlu0 %832 }
 0x2b7   : > { %v850_v41 = vmul.f32 %v833_v40, %v826_v39 }
 0x2b9   : > { %854 = vst.msk [vmem:[%s387_s21] sm:$0xff] %vm405_vm0, %v850_v41 }
 0x2ba   : > { %1340 = shalt.err (!%p1337_p13)
}
 0x2bb   : > { %s1410_s17 = smov 128   ;;  %s1411_s20 = smov 8  }
 0x2bc   : > { %1090 = dma.vmem_to_hbm [thread:$0]  (%p1492_p9), %s875_s22, 512, %s877_s11, %s859_s12, %s1410_s17, %s1410_s17, %s1411_s20  }
 0x2bd PF: > { %s1731_s19 = sld [smem:[#allocation20_spill]]  ;;  %s891_s29 = sand.u32 1, %s1383_s15  }
 0x2be   : > { %p1106_p0 = pnand %p1046_p12, %p1499_p11  ;;  %s892_s5 = scalar_lea.sflag [#allocation7], %s891_s29 }
 0x2c0   : > { %p1107_p1 = pneg %p1106_p0 }
 0x2c2   : > { %1378 = dma.done.wait (%p1107_p1), %s892_s5, 512  }
 0x2c3   : > { %1380 = vsyncadd (%p1107_p1), %s892_s5, 4294966784  ;;  %s26_s20 = sadd.s32 1, %s1731_s19   ;;  %s1732_s7 = sld [smem:[#allocation18_spill]] }
 0x2c4   : > { %p23_p2 = scmp.ge.s32.totalorder %s26_s20, 4   ;;  %s1733_s17 = sld [smem:[#allocation22_spill]] }
 0x2c5   : > { %s1734_s18 = sld [smem:[#allocation19_spill]]  ;;  %s1736_s15 = smov %s1387_s16 }
 0x2c6   : > { %s1735_s19 = sld [smem:[#allocation21_spill]]  ;;  %25 = sbr.rel (!%p23_p2) target bundleno = 13 (0xd), region = 126 }
 0x2c9   : > { %s1737_s16 = smov %s1732_s7 }
 0x2cb   :  { %898 = vsyncpa [#allocation6], 1 }
 0x2cc   :  { %900 = vsyncpa [#allocation6 + $0x1], 1 }
 0x2cd   :  { %901 = vsyncpa [#allocation9], 1 }
 0x2ce   :  { %903 = vsyncpa [#allocation9 + $0x1], 1 }
 0x2cf   :  { %904 = vsyncpa [#allocation12], 1 }
 0x2d0   :  { %906 = vsyncpa [#allocation12 + $0x1], 1 }
 0x2d1   :  { %907 = vsyncpa [#allocation7], 1 }
 0x2d2   :  { %909 = vsyncpa [#allocation7 + $0x1], 1 }

</bundles_post_ra>
